<compile_context>
chip_gen: v5e
topology: v5e:2x2
jax: 0.10.0
libtpu: 0.0.40
codegen_flags: <defaults>
</compile_context>

<pallas_src>
import jax
import jax.numpy as jnp
from jax.experimental import pallas as pl
from jax.experimental.pallas import tpu as pltpu

BN_EPS = 1e-6
LEAKY_SLOPE = 0.2


def bn_stats_kernel(x_ref, sx_ref, sxx_ref):
    """Accumulate per-channel sum (Cin,1) and second moment x@x^T (Cin,Cin)."""

    @pl.when(jnp.logical_and(pl.program_id(0) == 0, pl.program_id(1) == 0))
    def _init():
        sx_ref[...] = jnp.zeros_like(sx_ref)
        sxx_ref[...] = jnp.zeros_like(sxx_ref)

    x = x_ref[0]                                          # (Cin, TL), f32
    sx_ref[...] += jnp.sum(x, axis=1, keepdims=True)      # (Cin, 1)
    # Contract over the lane (L) axis of both operands: x @ x^T on the MXU.
    sxx_ref[...] += jax.lax.dot_general(
        x, x, (((1,), (1,)), ((), ())), preferred_element_type=jnp.float32)


def shared_mlp_kernel(x_ref, w_ref, b_ref, o_ref):
    """Fused (BN-folded) 1x1 conv + LeakyReLU on one (Cin, TL) tile.

    x_ref: (1, Cin, TL)   w_ref: (Cout, Cin)   b_ref: (Cout, 1)
    o_ref: (1, Cout, TL)  -- TL on lanes (lane-dense output stores).
    """
    x = x_ref[0]                                          # (Cin, TL)
    y = jnp.dot(w_ref[...], x, preferred_element_type=jnp.float32) + b_ref[...]
    # LeakyReLU(0.2) as a single max (one VALU op pair).
    o_ref[0] = jnp.maximum(y, LEAKY_SLOPE * y).astype(o_ref.dtype)


def _pick_tile_l(L, cap=2048):
    """Largest lane tile (multiple of 128) that divides L, capped for VMEM.

    Cap of 2048 keeps double-buffered (Cin + Cout) x TL f32 tiles well under
    v7x's 64 MiB VMEM even at Cin=Cout=512; v5e/v6e have more headroom.
    """
    for t in (4096, 2048, 1024, 512, 256, 128):
        if t <= cap and L % t == 0:
            return t
    return L  # awkward L: one full-width tile per batch (always legal)


def shared_mlp(x, weight, bias, gamma, beta, *, tile_l=None):
    """x: (B, Cin, N, K) -> (B, Cout, N, K).  weight: (Cout, Cin)."""
    B, Cin, N, K = x.shape
    Cout = weight.shape[0]
    L = N * K

    x3 = x.reshape(B, Cin, L)                     # free view, stays channel-major

    if tile_l is None or L % tile_l != 0:
        tile_l = _pick_tile_l(L)
    n_l = L // tile_l
    grid = (B, n_l)

    # ---- pass 1: first + second moments of x (small: Cin and Cin^2 outputs) ----
    sx, sxx = pl.pallas_call(
        bn_stats_kernel,
        out_shape=(
            jax.ShapeDtypeStruct((Cin, 1), jnp.float32),
            jax.ShapeDtypeStruct((Cin, Cin), jnp.float32),
        ),
        grid=grid,
        in_specs=[pl.BlockSpec((1, Cin, tile_l), lambda b, l: (b, 0, l))],
        out_specs=[
            pl.BlockSpec((Cin, 1), lambda b, l: (0, 0)),
            pl.BlockSpec((Cin, Cin), lambda b, l: (0, 0)),
        ],
        compiler_params=pltpu.CompilerParams(
            dimension_semantics=("arbitrary", "arbitrary")),
    )(x3)

    # ---- fold BatchNorm (training-mode batch stats) into the conv weights ----
    # y = W x + b is affine, so mean_y = W mean_x + b and
    # var_y = diag(W Cov_x W^T) with the biased sample covariance of x.
    m_total = float(B * L)
    mean_x = sx[:, 0] / m_total                                   # (Cin,)
    cov_x = sxx / m_total - jnp.outer(mean_x, mean_x)             # (Cin, Cin)
    mean_y = weight @ mean_x + bias                               # (Cout,)
    var_y = jnp.einsum("oc,cd,od->o", weight, cov_x, weight)      # (Cout,)
    var_y = jnp.maximum(var_y, 0.0)                               # roundoff guard
    inv = gamma * jax.lax.rsqrt(var_y + BN_EPS)                   # (Cout,)
    w_fold = weight * inv[:, None]                                # (Cout, Cin)
    b_fold = ((bias - mean_y) * inv + beta).reshape(Cout, 1)      # (Cout, 1)

    # ---- pass 2: single fused matmul + scale/shift + LeakyReLU over tiles ----
    bytes_accessed = 4 * (B * L * (Cin + Cout) + Cout * (Cin + 1))
    out3 = pl.pallas_call(
        shared_mlp_kernel,
        out_shape=jax.ShapeDtypeStruct((B, Cout, L), jnp.float32),
        grid=grid,
        in_specs=[
            pl.BlockSpec((1, Cin, tile_l), lambda b, l: (b, 0, l)),
            pl.BlockSpec((Cout, Cin), lambda b, l: (0, 0)),
            pl.BlockSpec((Cout, 1), lambda b, l: (0, 0)),
        ],
        out_specs=pl.BlockSpec((1, Cout, tile_l), lambda b, l: (b, 0, l)),
        compiler_params=pltpu.CompilerParams(
            dimension_semantics=("parallel", "parallel"),
            vmem_limit_bytes=48 * 1024 * 1024),
        cost_estimate=pl.CostEstimate(
            flops=2 * B * L * Cin * Cout,
            transcendentals=0,
            bytes_accessed=bytes_accessed),
    )(x3, w_fold, b_fold)

    return out3.reshape(B, Cout, N, K)


def reference_shared_mlp(x, weight, bias, gamma, beta):
    """Pure-JAX reference mirroring the PyTorch forward (sanity check)."""
    y = jnp.einsum("bcnk,oc->bonk", x, weight) + bias[None, :, None, None]
    mean = jnp.mean(y, axis=(0, 2, 3), keepdims=True)
    var = jnp.mean((y - mean) ** 2, axis=(0, 2, 3), keepdims=True)
    y = (y - mean) / jnp.sqrt(var + BN_EPS)
    y = y * gamma[None, :, None, None] + beta[None, :, None, None]
    return jnp.where(y > 0, y, LEAKY_SLOPE * y)


if __name__ == "__main__":
    # Small shapes consistent with SharedMLP forward: input (B, d_in, N, K).
    B, Cin, N, K = 2, 4, 32, 16       # L = N*K = 512
    Cout = 32

    key = jax.random.PRNGKey(0)
    kx, kw, kb, kg, kbeta = jax.random.split(key, 5)

    x = jax.random.normal(kx, (B, Cin, N, K), dtype=jnp.float32)
    # Conv2d(in, out, 1) weight is (Cout, Cin, 1, 1); we keep it as (Cout, Cin).
    weight = jax.random.normal(kw, (Cout, Cin), dtype=jnp.float32) * 0.1
    bias = jax.random.normal(kb, (Cout,), dtype=jnp.float32) * 0.1
    gamma = 1.0 + 0.1 * jax.random.normal(kg, (Cout,), dtype=jnp.float32)
    beta = 0.1 * jax.random.normal(kbeta, (Cout,), dtype=jnp.float32)

    # tile_l=128 exercises the multi-tile grid (2 batches x 4 lane tiles).
    out = shared_mlp(x, weight, bias, gamma, beta, tile_l=128)
    out = jax.block_until_ready(out)

    ref = reference_shared_mlp(x, weight, bias, gamma, beta)
    assert out.shape == (B, Cout, N, K)
    assert jnp.allclose(out, ref, atol=1e-3, rtol=1e-3), "mismatch vs reference"

    print("KERNEL_OK")
</pallas_src>

<mosaic_0001>
module attributes {stable_mosaic.version = 11 : i64} {
  func.func @bn_stats_kernel(%arg0: i32, %arg1: i32, %arg2: memref<1x4x128xf32, #tpu.memory_space<vmem>>, %arg3: memref<4x1xf32, #tpu.memory_space<vmem>>, %arg4: memref<4x4xf32, #tpu.memory_space<vmem>>) attributes {dimension_semantics = [#tpu.dimension_semantics<arbitrary>, #tpu.dimension_semantics<arbitrary>], iteration_bounds = array<i64: 2, 4>, scalar_prefetch = 0 : i64, scratch_operands = 0 : i64, tpu.core_type = #tpu.core_type<tc>, window_params = [{transform_indices = @transform_0, window_bounds = array<i64: 1, 4, 128>}, {pipeline_mode = #tpu.pipeline_mode<synchronous>, transform_indices = @transform_1, window_bounds = array<i64: 4, 1>}, {pipeline_mode = #tpu.pipeline_mode<synchronous>, transform_indices = @transform_2, window_bounds = array<i64: 4, 4>}]} {
    %c0_i32 = arith.constant 0 : i32
    %0 = arith.cmpi eq, %arg0, %c0_i32 : i32
    %c0_i32_0 = arith.constant 0 : i32
    %1 = arith.cmpi eq, %arg1, %c0_i32_0 : i32
    %2 = arith.andi %0, %1 : i1
    %3 = arith.extui %2 : i1 to i32
    %c0_i32_1 = arith.constant 0 : i32
    %4 = arith.cmpi ne, %3, %c0_i32_1 : i32
    scf.if %4 {
      %cst_13 = arith.constant 0.000000e+00 : f32
      %16 = vector.broadcast %cst_13 : f32 to vector<4x1xf32>
      %c0_14 = arith.constant 0 : index
      %c0_15 = arith.constant 0 : index
      %17 = vector.load %arg3[%c0_14, %c0_15] : memref<4x1xf32, #tpu.memory_space<vmem>>, vector<4x1xf32>
      tpu.vector_store %arg3[%c0_14, %c0_15], %16 {strides = array<i32>} : memref<4x1xf32, #tpu.memory_space<vmem>>, vector<4x1xf32>,
      %cst_16 = arith.constant 0.000000e+00 : f32
      %18 = vector.broadcast %cst_16 : f32 to vector<4x4xf32>
      %c0_17 = arith.constant 0 : index
      %c0_18 = arith.constant 0 : index
      %19 = vector.load %arg4[%c0_17, %c0_18] : memref<4x4xf32, #tpu.memory_space<vmem>>, vector<4x4xf32>
      tpu.vector_store %arg4[%c0_17, %c0_18], %18 {strides = array<i32>} : memref<4x4xf32, #tpu.memory_space<vmem>>, vector<4x4xf32>,
    } else {
    }
    %c0 = arith.constant 0 : index
    %c0_2 = arith.constant 0 : index
    %c0_3 = arith.constant 0 : index
    %5 = vector.load %arg2[%c0, %c0_2, %c0_3] : memref<1x4x128xf32, #tpu.memory_space<vmem>>, vector<1x4x128xf32>
    %6 = vector.shape_cast %5 : vector<1x4x128xf32> to vector<4x128xf32>
    %c0_4 = arith.constant 0 : index
    %c0_5 = arith.constant 0 : index
    %7 = vector.load %arg3[%c0_4, %c0_5] : memref<4x1xf32, #tpu.memory_space<vmem>>, vector<4x1xf32>
    %cst = arith.constant dense<0.000000e+00> : vector<4xf32>
    %8 = vector.multi_reduction <add>, %6, %cst [1] : vector<4x128xf32> to vector<4xf32>
    %9 = vector.shape_cast %8 : vector<4xf32> to vector<4x1xf32>
    %10 = arith.addf %7, %9 : vector<4x1xf32>
    %c0_6 = arith.constant 0 : index
    %c0_7 = arith.constant 0 : index
    %11 = vector.load %arg3[%c0_6, %c0_7] : memref<4x1xf32, #tpu.memory_space<vmem>>, vector<4x1xf32>
    tpu.vector_store %arg3[%c0_6, %c0_7], %10 {strides = array<i32>} : memref<4x1xf32, #tpu.memory_space<vmem>>, vector<4x1xf32>,
    %c0_8 = arith.constant 0 : index
    %c0_9 = arith.constant 0 : index
    %12 = vector.load %arg4[%c0_8, %c0_9] : memref<4x4xf32, #tpu.memory_space<vmem>>, vector<4x4xf32>
    %cst_10 = arith.constant dense<0.000000e+00> : vector<4x4xf32>
    %13 = tpu.matmul %6, %6, %cst_10 {dimension_numbers = #tpu.dot_dimension_numbers<[1], [1], [0], [0], [0, 0, 1, 0], [], []>} : vector<4x128xf32>, vector<4x128xf32>, vector<4x4xf32> -> vector<4x4xf32>
    %14 = arith.addf %12, %13 : vector<4x4xf32>
    %c0_11 = arith.constant 0 : index
    %c0_12 = arith.constant 0 : index
    %15 = vector.load %arg4[%c0_11, %c0_12] : memref<4x4xf32, #tpu.memory_space<vmem>>, vector<4x4xf32>
    tpu.vector_store %arg4[%c0_11, %c0_12], %14 {strides = array<i32>} : memref<4x4xf32, #tpu.memory_space<vmem>>, vector<4x4xf32>,
    return
  }
  func.func @transform_0(%arg0: i32, %arg1: i32) -> (i32, i32, i32) {
    %c0_i32 = arith.constant 0 : i32
    %c0_i32_0 = arith.constant 0 : i32
    return %arg0, %c0_i32, %arg1 : i32, i32, i32
  }
  func.func @transform_1(%arg0: i32, %arg1: i32) -> (i32, i32) {
    %c0_i32 = arith.constant 0 : i32
    %c0_i32_0 = arith.constant 0 : i32
    %c0_i32_1 = arith.constant 0 : i32
    return %c0_i32, %c0_i32_0 : i32, i32
  }
  func.func @transform_2(%arg0: i32, %arg1: i32) -> (i32, i32) {
    %c0_i32 = arith.constant 0 : i32
    %c0_i32_0 = arith.constant 0 : i32
    %c0_i32_1 = arith.constant 0 : i32
    return %c0_i32, %c0_i32_0 : i32, i32
  }
}

</mosaic_0001>

<bundles_post_ra>
// kernel: tpu_custom_call.1
= control target key start
LH: loop header
LB: loop body
LE: loop exit
PB: predicated region body
PF: predicated region fallthrough
CT: control target
= control target key end

     0   :  { %8 = vsyncpa [#allocation3], 0  ;;  %s649_s0 = inlined_call_operand.hbm [shape: f32[2,4,512], index: 0, kind: input, shape index: {}]   ;;  %s650_s1 = inlined_call_operand.vmem [shape: f32[4,1], index: 1, kind: output, shape index: {0}]   ;;  %s651_s2 = inlined_call_operand.hbm [shape: f32[4,4], index: 2, kind: output, shape index: {1}]  }
   0x1   :  { %10 = vsyncpa [#allocation3 + $0x1], 0 }
   0x2   :  { %11 = vsyncpa [#allocation4], 0  ;;  %s523_s9 = smov 0   ;;  %s525_s10 = smov 0  }
   0x3   :  { %s527_s11 = smov 0   ;;  %s529_s12 = smov 0  }
   0x4   :  { %s531_s13 = smov 0   ;;  %s533_s14 = smov 0  }
   0x5   :  { %s535_s15 = smov 0   ;;  %s537_s16 = smov 0  }
   0x6 LB: > { %s285_s17 = sadd.s32 4294967295, %s504_s16   ;;  %s26_s18 = sadd.s32 1, %s496_s14  ;;  %s504_s16 = sphi %s537_s16, %s17_s16   ;;  %s500_s15 = sphi %s535_s15, %s660_s15   ;;  %s496_s14 = sphi %s533_s14, %s659_s14   ;;  %s492_s13 = sphi %s531_s13, %s658_s13   ;;  %s488_s12 = sphi %s529_s12, %s657_s12   ;;  %s484_s11 = sphi %s527_s11, %s656_s11   ;;  %s480_s10 = sphi %s525_s10, %s655_s10   ;;  %s476_s9 = sphi %s523_s9, %s654_s9  }
   0x7   : > { %p27_p0 = scmp.ge.s32.totalorder %s26_s18, 4  ;;  %s29_s19 = sadd.s32 1, %s500_s15 }
   0x8   : > { %s38_s20 = sadd.s32 1, %s484_s11  ;;  %p45_p1 = scmp.ne.s32.totalorder %s484_s11, %s480_s10 }
   0x9   : > { %s662_s18 = smov (%p27_p0, %s26_s18), 0  ;;  %s664_s19 = smov (!%p27_p0, %s29_s19), %s500_s15 }
   0xa   : > { %s34_s21 = ssub.s32 %s496_s14, %s662_s18  ;;  %p46_p2 = scmp.eq.s32.totalorder %s504_s16, 0 }
   0xb   : > { %p31_p3 = scmp.ge.s32.totalorder %s664_s19, 2  ;;  %p51_p4 = scmp.ne.s32.totalorder %s480_s10, %s476_s9 }
   0xc   : > { %p574_p5 = por %p46_p2, %p45_p1  ;;  %p52_p6 = scmp.eq.s32.totalorder %s285_s17, 0 }
   0xd   : > { %s666_s19 = smov (%p31_p3, %s664_s19), 0  ;;  %p307_p8 = scmp.lt.s32.totalorder %s504_s16, 8 }
   0xe   : > { %p582_p7 = por %p52_p6, %p51_p4  ;;  %s33_s24 = ssub.s32 %s500_s15, %s666_s19 }
   0xf   : > { %s35_s25 = sor.u32 %s34_s21, %s33_s24  ;;  %s117_s26 = sand.u32 1, %s484_s11  }
  0x10   : > { %p36_p9 = scmp.eq.s32.totalorder %s35_s25, 0  ;;  %s288_s27 = sshll.u32 %s117_s26, 2 }
  0x11   : > { %s289_s28 = sshll.u32 %s500_s15, 2  ;;  %s121_s4 = scalar_lea.vmem [#allocation2], %s288_s27 }
  0x12   : > { %s592_s29 = scalar_select %p36_p9, %s484_s11, %s38_s20  }
  0x13   : > { %s125_s30 = sadd.s32 %s496_s14, %s289_s28  ;;  %s131_s5 = sshll.u32 %s121_s4, 4  ;;  %s132_s5 = int_to_ptr.vmem [resolvable:$true] %s131_s5 }
  0x14   : > { %s290_s3 = sshll.u32 %s125_s30, 2  ;;  %p304_p10 = pnand %p307_p8, %p574_p5 }
  0x15   : > { %s127_s8 = scalar_lea.hbm %s649_s0, %s290_s3  ;;  %p291_p11 = scmp.ge.s32.totalorder %s504_s16, 1 }
  0x16   : > { %s129_s9 = sshll.u32 %s127_s8, 4  ;;  %p136_p12 = scmp.lt.s32.totalorder %s504_s16, 9  ;;  %s130_s9 = int_to_ptr.hbm [resolvable:$true] %s129_s9 }
  0x17   : > { %s118_s21 = scalar_lea.sflag [#allocation3], %s117_s26 }
  0x18   : > { %306 = dma.hbm_to_vmem [thread:$0]  (!%p304_p10), %s130_s9, 64, %s132_s5, %s118_s21  }
  0x19   : > { %p137_p13 = pnand %p291_p11, %p136_p12 }
  0x1a   : > { %s142_s20 = sand.u32 (!%p137_p13), 1, %s480_s10  }
  0x1b   : > { %140 = sbr.rel (%p137_p13) target bundleno = 181 (0xb5), region = 24  ;;  %s292_s24 = sshll.u32 (!%p137_p13), %s142_s20, 2 }
  0x1c   : > { %s143_s25 = scalar_lea.sflag (!%p137_p13), [#allocation3], %s142_s20  ;;  %s146_s27 = scalar_lea.vmem (!%p137_p13), [#allocation2], %s292_s24 }
  0x20   : > { %467 = dma.done.wait (%p582_p7), %s143_s25, 64  }
  0x21   : > { %469 = vsyncadd (%p582_p7), %s143_s25, 4294967232  ;;  %p163_p0 = scmp.eq.s32.totalorder %s492_s13, 0  ;;  %p164_p1 = scmp.eq.s32.totalorder %s488_s12, 0 }
  0x23   : > { %p165_p2 = pnand %p164_p1, %p163_p0 }
  0x25   : > { %168 = sbr.rel (%p165_p2) target bundleno = 45 (0x2d), region = 32 }
  0x2a   : > { %vm169_vm0 = vcmask 3072   ;;  %vm171_vm1 = vcmask 27648   ;;  %v506_v0 = vmov 0.0  }
  0x2b   : > { %170 = vst.msk [vmem:[%s650_s1] sm:$0xf] %vm169_vm0, %v506_v0 }
  0x2c   : > { %172 = vst.msk [vmem:[#allocation5] sm:$0xf] %vm171_vm1, %v506_v0 }
  0x2d PF: > { %v173_v1 = vld [vmem:[%s146_s27] sm:$0xf]  ;;  %vm175_vm2 = vcmask 1043456   ;;  %vm180_vm3 = vcmask 3072   ;;  %s507_s30 = smov [#allocation5]   ;;  %s217_s6 = sshll.u32 %s651_s2, 4  ;;  %s218_s6 = int_to_ptr.hbm [resolvable:$true] %s217_s6 }
  0x2e   : > { %198 = vmatpush.xpose.msra.mxu0 %v173_v1  ;;  %v176_v2 = vsel %vm175_vm2, %v173_v1, 0.0  ;;  %s215_s3 = sshll.u32 %s507_s30, 4  ;;  %vm204_vm4 = vcmask 27648   ;;  %p308_p3 = scmp.eq.s32.totalorder %s285_s17, 7  ;;  %s216_s3 = int_to_ptr.vmem [resolvable:$true] %s215_s3 }
  0x2f   : > { %177 = vadd.xlane.f32.xlu0 %v176_v2 }
  0x31   : > { %199 = vmatmul.f32.vlgmr.msra.gmra.mxu0 %v173_v1 }
  0x32   : > { %v174_v3 = vld [vmem:[%s650_s1] sm:$0xf] }
  0x33   : > { %v182_v6 = vld [vmem:[#allocation5] sm:$0xf] }
  0xa2   : > { %v178_v4 = vpop.xlane.xlu0 %177 }
  0xa3   : > { %v179_v5 = vadd.f32 %v178_v4, %v174_v3 }
  0xa5   : > { %181 = vst.msk [vmem:[%s650_s1] sm:$0xf] %vm180_vm3, %v179_v5 }
  0xae   : > { %v200_v7 = vpop.f32.mrf.mxu0 }
  0xaf   : > { %v203_v8 = vadd.f32 %v200_v7, %v182_v6 }
  0xb1   : > { %205 = vst.msk [vmem:[#allocation5] sm:$0xf] %vm204_vm4, %v203_v8 }
  0xb2   : > { %300 = dma.vmem_to_hbm [thread:$0]  (%p308_p3), %s216_s3, 64, %s218_s6, [#allocation4]  }
  0xb3   : > { %471 = dma.done.wait (%p308_p3), [#allocation4], 64  }
  0xb4   : > { %473 = vsyncadd (%p308_p3), [#allocation4], 4294967232 }
  0xb5 PF: > { %s17_s16 = sadd.s32 1, %s504_s16   ;;  %s654_s9 = smov %s480_s10 }
  0xb6   : > { %p14_p4 = scmp.ge.s32.totalorder %s17_s16, 10   ;;  %s655_s10 = smov %s484_s11 }
  0xb7   : > { %s656_s11 = smov %s592_s29  ;;  %s657_s12 = smov %s496_s14 }
  0xb8   : > { %s658_s13 = smov %s500_s15  ;;  %s659_s14 = smov %s662_s18 }
  0xb9   : > { %s660_s15 = smov %s666_s19  ;;  %16 = sbr.rel (!%p14_p4) target bundleno = 6 (0x6), region = 73 }
  0xbe   :  { %234 = vsyncpa [#allocation3], 1 }
  0xbf   :  { %236 = vsyncpa [#allocation3 + $0x1], 1 }
  0xc0   :  { %237 = vsyncpa [#allocation4], 1 }
  0xc1   :  { %239 = vsyncpa [#allocation4 + $0x1], 1 }

</bundles_post_ra>
